<compile_context>
chip_gen: v7x
topology: tpu7x:2x2x1
jax: 0.10.0
libtpu: 0.0.40
codegen_flags: <defaults>
</compile_context>

<pallas_src>
import functools

import jax
import jax.numpy as jnp
from jax.experimental import pallas as pl
from jax.experimental.pallas import tpu as pltpu


def _std_sum_kernel(x_ref, sum_ref, *, alpha, inv_b):
    """Accumulate sum over positions of the per-position batch std.

    x_ref:   (B, TP) lane-dense tile of the (B, C*H*W) input view.
    sum_ref: (1, 1) float32 accumulator, resident across the reduction grid.
    """
    i = pl.program_id(0)

    @pl.when(i == 0)
    def _():
        sum_ref[...] = jnp.zeros_like(sum_ref)

    x = x_ref[...].astype(jnp.float32)                      # (B, TP)
    # One-pass biased variance over the batch axis: E[x^2] - E[x]^2.
    m1 = jnp.sum(x, axis=0, keepdims=True) * inv_b          # (1, TP)  E[x]
    m2 = jnp.sum(x * x, axis=0, keepdims=True) * inv_b      # (1, TP)  E[x^2]
    var = jnp.maximum(m2 - m1 * m1, 0.0)                    # clamp cancellation
    std = jnp.sqrt(var + alpha)                             # (1, TP)
    sum_ref[...] += jnp.sum(std, axis=1, keepdims=True)     # (1, 1)


def _pick_tile(p, b, elem_bytes=4, vmem_block_budget=4 * 1024 * 1024):
    """Largest multiple of 128 that divides p and keeps the block small."""
    if p % 128 != 0:
        return p  # fall back: single full block (last dim == full array dim)
    cap = max(128, (vmem_block_budget // (b * elem_bytes)) // 128 * 128)
    best, t = 128, 128
    while t <= min(p, cap):
        if p % t == 0:
            best = t
        t += 128
    return best


def minibatch_stddev(x, alpha=1e-8):
    """Pallas implementation of MinibatchStdDev.forward(x, alpha)."""
    B, C, H, W = x.shape
    P = C * H * W
    x2d = x.reshape(B, P)                 # lane-dense view (free reshape)
    tp = _pick_tile(P, B)
    grid = (P // tp,)

    kernel = functools.partial(
        _std_sum_kernel, alpha=float(alpha), inv_b=1.0 / float(B))

    sum_std = pl.pallas_call(
        kernel,
        grid=grid,
        in_specs=[pl.BlockSpec((B, tp), lambda i: (0, i))],
        out_specs=pl.BlockSpec((1, 1), lambda i: (0, 0)),   # resident accumulator
        out_shape=jax.ShapeDtypeStruct((1, 1), jnp.float32),
        compiler_params=pltpu.CompilerParams(
            dimension_semantics=("arbitrary",)),            # reduction axis
    )(x2d)

    s = (sum_std[0, 0] / jnp.float32(P)).astype(x.dtype)    # mean of std
    extra = jnp.broadcast_to(s, (B, 1, H, W))
    # Pass-through copy + concat left to XLA (no VMEM round trip needed).
    return jnp.concatenate([x, extra], axis=1)


def _reference(x, alpha=1e-8):
    # Pure-JAX reference mirroring the PyTorch forward exactly.
    B, C, H, W = x.shape
    y = x - jnp.mean(x, axis=0, keepdims=True)
    y = jnp.sqrt(jnp.mean(y ** 2, axis=0) + alpha)           # (C, H, W)
    s = jnp.mean(y).reshape(1, 1, 1, 1)
    s = jnp.broadcast_to(s, (B, 1, H, W)).astype(x.dtype)
    return jnp.concatenate([x, s], axis=1)


if __name__ == "__main__":
    key = jax.random.PRNGKey(0)
    x = jax.random.normal(key, (2, 4, 16, 16), dtype=jnp.float32)

    out = jax.block_until_ready(minibatch_stddev(x))

    ref = _reference(x)
    assert out.shape == (2, 5, 16, 16), out.shape
    assert jnp.allclose(out, ref, atol=1e-5, rtol=1e-5), "mismatch vs reference"

    print("KERNEL_OK")
</pallas_src>

<mosaic_0001>
module attributes {stable_mosaic.version = 11 : i64} {
  func.func @_std_sum_kernel(%arg0: i32, %arg1: memref<2x1024xf32, #tpu.memory_space<vmem>>, %arg2: memref<1x1xf32, #tpu.memory_space<vmem>>) attributes {dimension_semantics = [#tpu.dimension_semantics<arbitrary>], iteration_bounds = array<i64: 1>, scalar_prefetch = 0 : i64, scratch_operands = 0 : i64, tpu.core_type = #tpu.core_type<tc>, window_params = [{transform_indices = @transform_0, window_bounds = array<i64: 2, 1024>}, {pipeline_mode = #tpu.pipeline_mode<synchronous>, transform_indices = @transform_1, window_bounds = array<i64: 1, 1>}]} {
    %c0_i32 = arith.constant 0 : i32
    %0 = arith.cmpi eq, %arg0, %c0_i32 : i32
    %1 = arith.extui %0 : i1 to i32
    %c0_i32_0 = arith.constant 0 : i32
    %2 = arith.cmpi ne, %1, %c0_i32_0 : i32
    scf.if %2 {
      %cst_12 = arith.constant 0.000000e+00 : f32
      %25 = vector.broadcast %cst_12 : f32 to vector<1x1xf32>
      %c0_13 = arith.constant 0 : index
      %c0_14 = arith.constant 0 : index
      %26 = vector.load %arg2[%c0_13, %c0_14] : memref<1x1xf32, #tpu.memory_space<vmem>>, vector<1x1xf32>
      tpu.vector_store %arg2[%c0_13, %c0_14], %25 {strides = array<i32>} : memref<1x1xf32, #tpu.memory_space<vmem>>, vector<1x1xf32>,
    } else {
    }
    %c0 = arith.constant 0 : index
    %c0_1 = arith.constant 0 : index
    %3 = vector.load %arg1[%c0, %c0_1] : memref<2x1024xf32, #tpu.memory_space<vmem>>, vector<2x1024xf32>
    %cst = arith.constant dense<0.000000e+00> : vector<1024xf32>
    %4 = vector.multi_reduction <add>, %3, %cst [0] : vector<2x1024xf32> to vector<1024xf32>
    %5 = vector.shape_cast %4 : vector<1024xf32> to vector<1x1024xf32>
    %cst_2 = arith.constant 5.000000e-01 : f32
    %6 = vector.broadcast %cst_2 : f32 to vector<1x1024xf32>
    %7 = arith.mulf %5, %6 : vector<1x1024xf32>
    %8 = arith.mulf %3, %3 : vector<2x1024xf32>
    %cst_3 = arith.constant dense<0.000000e+00> : vector<1024xf32>
    %9 = vector.multi_reduction <add>, %8, %cst_3 [0] : vector<2x1024xf32> to vector<1024xf32>
    %10 = vector.shape_cast %9 : vector<1024xf32> to vector<1x1024xf32>
    %cst_4 = arith.constant 5.000000e-01 : f32
    %11 = vector.broadcast %cst_4 : f32 to vector<1x1024xf32>
    %12 = arith.mulf %10, %11 : vector<1x1024xf32>
    %13 = arith.mulf %7, %7 : vector<1x1024xf32>
    %14 = arith.subf %12, %13 : vector<1x1024xf32>
    %cst_5 = arith.constant 0.000000e+00 : f32
    %15 = vector.broadcast %cst_5 : f32 to vector<1x1024xf32>
    %16 = arith.maximumf %14, %15 : vector<1x1024xf32>
    %cst_6 = arith.constant 9.99999993E-9 : f32
    %17 = vector.broadcast %cst_6 : f32 to vector<1x1024xf32>
    %18 = arith.addf %16, %17 : vector<1x1024xf32>
    %19 = math.sqrt %18 : vector<1x1024xf32>
    %c0_7 = arith.constant 0 : index
    %c0_8 = arith.constant 0 : index
    %20 = vector.load %arg2[%c0_7, %c0_8] : memref<1x1xf32, #tpu.memory_space<vmem>>, vector<1x1xf32>
    %cst_9 = arith.constant dense<0.000000e+00> : vector<1xf32>
    %21 = vector.multi_reduction <add>, %19, %cst_9 [1] : vector<1x1024xf32> to vector<1xf32>
    %22 = vector.shape_cast %21 : vector<1xf32> to vector<1x1xf32>
    %23 = arith.addf %20, %22 : vector<1x1xf32>
    %c0_10 = arith.constant 0 : index
    %c0_11 = arith.constant 0 : index
    %24 = vector.load %arg2[%c0_10, %c0_11] : memref<1x1xf32, #tpu.memory_space<vmem>>, vector<1x1xf32>
    tpu.vector_store %arg2[%c0_10, %c0_11], %23 {strides = array<i32>} : memref<1x1xf32, #tpu.memory_space<vmem>>, vector<1x1xf32>,
    return
  }
  func.func @transform_0(%arg0: i32) -> (i32, i32) {
    %c0_i32 = arith.constant 0 : i32
    %c0_i32_0 = arith.constant 0 : i32
    return %c0_i32, %arg0 : i32, i32
  }
  func.func @transform_1(%arg0: i32) -> (i32, i32) {
    %c0_i32 = arith.constant 0 : i32
    %c0_i32_0 = arith.constant 0 : i32
    %c0_i32_1 = arith.constant 0 : i32
    return %c0_i32, %c0_i32_0 : i32, i32
  }
}

</mosaic_0001>

<bundles_post_ra>
// kernel: tpu_custom_call.1
= control target key start
LH: loop header
LB: loop body
LE: loop exit
PB: predicated region body
PF: predicated region fallthrough
CT: control target
= control target key end

     0   :  { %6 = vsyncpa [#allocation3], 0  ;;  %s582_s0 = inlined_call_operand.hbm [shape: f32[2,1024], index: 0, kind: input, shape index: {}]   ;;  %s583_s1 = inlined_call_operand.hbm [shape: f32[1,1], index: 1, kind: output, shape index: {}]  }
   0x1   :  { %7 = vsyncpa [#allocation4], 0  ;;  %s434_s6 = smov [#allocation2]   ;;  %s386_s10 = scalar_lea.hbm %s582_s0, 256 }
   0x2   :  { %s14_s7 = sshll.u32 %s434_s6, 4  ;;  %p387_p0 = scmp.ne.s32.totalorder %s582_s0, %s386_s10  ;;  %s15_s7 = int_to_ptr.vmem [resolvable:$true] %s14_s7 }
   0x3   :  { %p390_p1 = scmp.lt.u32.totalorder %s386_s10, %s582_s0 }
   0x5   :  { %p392_p2 = pnand %p390_p1, %p387_p0 }
   0x7   :  { %395 = shalt.err (!%p392_p2)
}
   0x8   :  { %s396_s15 = scalar_lea.vmem %s15_s7, 256  ;;  %p401_p4 = scmp.lt.s32.totalorder %s15_s7, %s15_s7 }
   0x9   :  { %p397_p3 = scmp.ne.s32.totalorder %s15_s7, %s396_s15  ;;  %p402_p5 = scmp.lt.s32.totalorder %s396_s15, %s396_s15 }
   0xb   :  { %p403_p6 = por %p402_p5, %p401_p4 }
   0xd   :  { %p404_p7 = pnand %p403_p6, %p397_p3 }
   0xf   :  { %407 = shalt.err (!%p404_p7)
}
  0x10   :  { %17 = dma.hbm_to_vmem [thread:$0]  %s582_s0, 256, %s15_s7, [#allocation3]  }
  0x11   :  { %430 = dma.done.wait [#allocation3], 256  }
  0x12   :  { %431 = vsyncadd [#allocation3], 4294967040  ;;  %vm25_vm0 = vcmask 0   ;;  %v35_v0 = vlaneseq  ;;  %v435_v1 = vmov 0.0   ;;  %v436_v2 = vmov 1983009808  }
  0x13   :  { %26 = vst.msk [vmem:[#allocation5] sm:$0x1] %vm25_vm0, %v435_v1  ;;  %v33_v3 = vunpack.c.l.s4 %v436_v2  ;;  %v27_v7 = vld [vmem:[#allocation2] sm:$0xff]  ;;  %v28_v8 = vld [vmem:[#allocation2 + $0x8] sm:$0xff]  ;;  %vm73_vm1 = vcmask 1041408   ;;  %s437_s0 = smov [#allocation5]  }
  0x14   :  { %v36_v4 = vshrl.u32 %v35_v0, 7  ;;  %v31_v9 = vcombine.high %v27_v7, %v27_v7  ;;  %v48_v11 = vcombine.high %v28_v8, %v28_v8  ;;  %v465_v13 = vmul.f32 %v27_v7, %v27_v7  ;;  %s355_s18 = sshll.u32 %s437_s0, 4  ;;  %s356_s18 = int_to_ptr.vmem [resolvable:$true] %s355_s18 }
  0x15   :  { %v34_v5 = vunpack.c.0.s8 %v33_v3  ;;  %v467_v14 = vmul.f32 %v28_v8, %v28_v8  ;;  %s408_s19 = scalar_lea.vmem %s356_s18, 16  ;;  %s412_s20 = scalar_lea.vmem %s356_s18, 32 }
  0x16   :  { %v142_v21 = vcombine.high %v465_v13, %v465_v13  ;;  %p409_p8 = scmp.ne.s32.totalorder %s356_s18, %s408_s19  ;;  %p413_p9 = scmp.lt.s32.totalorder %s356_s18, %s356_s18 }
  0x17   :  { %v461_v6 = vsub.s32 %v34_v5, %v36_v4  ;;  %p414_p10 = scmp.lt.s32.totalorder %s412_s20, %s408_s19 }
  0x19   :  { %v38_v10 = vrot.slane %v27_v7, %v461_v6  ;;  %v55_v12 = vrot.slane %v28_v8, %v461_v6  ;;  %v45_v15 = vrot.slane %v31_v9, %v461_v6  ;;  %v62_v17 = vrot.slane %v48_v11, %v461_v6  ;;  %p415_p11 = por %p414_p10, %p413_p9 }
  0x1a   :  { %v477_v22 = vrot.slane %v465_v13, %v461_v6 }
  0x1b   :  { %v46_v16 = vcombine.high %v38_v10, %v38_v10  ;;  %v63_v18 = vcombine.high %v55_v12, %v55_v12  ;;  %v74_v19 = vsel %vm73_vm1, %v38_v10, 0.0  ;;  %v102_v20 = vsel %vm73_vm1, %v55_v12, 0.0  ;;  %p416_p12 = pnand %p415_p11, %p409_p8 }
  0x1c   :  { %v47_v23 = vcombine.high %v45_v15, %v45_v15  ;;  %v64_v24 = vcombine.high %v62_v17, %v62_v17  ;;  %v75_v25 = vrot.slane %v74_v19, 4  ;;  %v88_v28 = vsel %vm73_vm1, %v45_v15, 0.0 }
  0x1d   :  { %v81_v26 = vsel %vm73_vm1, %v46_v16, 0.0  ;;  %v103_v29 = vrot.slane %v102_v20, 4  ;;  %v109_v30 = vsel %vm73_vm1, %v63_v18, 0.0  ;;  %v89_v32 = vrot.slane %v88_v28, 4 }
  0x1e   :  { %v82_v27 = vrot.slane %v81_v26, 4  ;;  %v76_v31 = vadd.f32 %v75_v25, %v74_v19  ;;  %v95_v33 = vsel %vm73_vm1, %v47_v23, 0.0  ;;  %v110_v34 = vrot.slane %v109_v30, 4 }
  0x1f   :  { %v96_v36 = vrot.slane %v95_v33, 4  ;;  %v104_v37 = vadd.f32 %v103_v29, %v102_v20  ;;  %v116_v38 = vsel %vm73_vm1, %v62_v17, 0.0  ;;  %v90_v40 = vadd.f32 %v89_v32, %v88_v28 }
  0x20   :  { %v83_v35 = vadd.f32 %v82_v27, %v81_v26  ;;  %v77_v39 = vrot.slane %v76_v31, 2  ;;  %v111_v41 = vadd.f32 %v110_v34, %v109_v30  ;;  %v117_v42 = vrot.slane %v116_v38, 4 }
  0x21   :  { %v97_v44 = vadd.f32 %v96_v36, %v95_v33  ;;  %v105_v45 = vrot.slane %v104_v37, 2  ;;  %v123_v46 = vsel %vm73_vm1, %v64_v24, 0.0  ;;  %v91_v48 = vrot.slane %v90_v40, 2 }
  0x22   :  { %v84_v43 = vrot.slane %v83_v35, 2  ;;  %v78_v47 = vadd.f32 %v77_v39, %v76_v31  ;;  %v112_v49 = vrot.slane %v111_v41, 2  ;;  %v118_v50 = vadd.f32 %v117_v42, %v116_v38 }
  0x23   :  { %v98_v52 = vrot.slane %v97_v44, 2  ;;  %v106_v53 = vadd.f32 %v105_v45, %v104_v37  ;;  %v124_v54 = vrot.slane %v123_v46, 4  ;;  %v92_v56 = vadd.f32 %v91_v48, %v90_v40 }
  0x24   :  { %v85_v51 = vadd.f32 %v84_v43, %v83_v35  ;;  %v79_v55 = vrot.slane %v78_v47, 1  ;;  %v113_v57 = vadd.f32 %v112_v49, %v111_v41  ;;  %v119_v58 = vrot.slane %v118_v50, 2 }
  0x25   :  { %v99_v60 = vadd.f32 %v98_v52, %v97_v44  ;;  %v107_v61 = vrot.slane %v106_v53, 1  ;;  %v125_v62 = vadd.f32 %v124_v54, %v123_v46  ;;  %v93_v0 = vrot.slane %v92_v56, 1 }
  0x26   :  { %v86_v59 = vrot.slane %v85_v51, 1  ;;  %v80_v63 = vadd.f32 %v79_v55, %v78_v47  ;;  %v114_v1 = vrot.slane %v113_v57, 1  ;;  %v120_v2 = vadd.f32 %v119_v58, %v118_v50 }
  0x27   :  { %v100_v4 = vrot.slane %v99_v60, 1  ;;  %v108_v5 = vadd.f32 %v107_v61, %v106_v53  ;;  %v126_v7 = vrot.slane %v125_v62, 2  ;;  %v94_v8 = vadd.f32 %v93_v0, %v92_v56 }
  0x28   :  { %v87_v3 = vadd.f32 %v86_v59, %v85_v51  ;;  %v115_v9 = vadd.f32 %v114_v1, %v113_v57  ;;  %v121_v10 = vrot.slane %v120_v2, 1  ;;  %v485_v11 = vmul.f32 0.5, %v80_v63 }
  0x29   :  { %v101_v12 = vadd.f32 %v100_v4, %v99_v60  ;;  %v127_v13 = vadd.f32 %v126_v7, %v125_v62  ;;  %v489_v16 = vmul.f32 0.5, %v108_v5  ;;  %v491_v18 = vmul.f32 0.5, %v94_v8 }
  0x2a   :  { %v487_v15 = vmul.f32 0.5, %v87_v3  ;;  %v122_v17 = vadd.f32 %v121_v10, %v120_v2  ;;  %v493_v19 = vmul.f32 0.5, %v115_v9  ;;  %v156_v20 = vrot.slane %v142_v21, %v461_v6 }
  0x2b   :  { %v128_v23 = vrot.slane %v127_v13, 1  ;;  %v496_v24 = vmul.f32 0.5, %v101_v12  ;;  %v157_v25 = vcombine.high %v477_v22, %v477_v22  ;;  %v159_v26 = vcombine.high %v467_v14, %v467_v14 }
  0x2c   :  { %v502_v27 = vmul.f32 0.5, %v122_v17  ;;  %v158_v28 = vcombine.high %v156_v20, %v156_v20  ;;  %v166_v29 = vrot.slane %v467_v14, %v461_v6  ;;  %v184_v30 = vsel %vm73_vm1, %v477_v22, 0.0 }
  0x2d   :  { %v129_v31 = vadd.f32 %v128_v23, %v127_v13  ;;  %v173_v21 = vrot.slane %v159_v26, %v461_v6  ;;  %v185_v32 = vrot.slane %v184_v30, 4  ;;  %v191_v33 = vsel %vm73_vm1, %v157_v25, 0.0 }
  0x2e   :  { %v174_v34 = vcombine.high %v166_v29, %v166_v29  ;;  %v192_v35 = vrot.slane %v191_v33, 4  ;;  %v198_v36 = vsel %vm73_vm1, %v156_v20, 0.0  ;;  %v205_v37 = vsel %vm73_vm1, %v158_v28, 0.0 }
  0x2f   :  { %v512_v38 = vmul.f32 0.5, %v129_v31  ;;  %v175_v39 = vcombine.high %v173_v21, %v173_v21  ;;  %v186_v40 = vadd.f32 %v185_v32, %v184_v30  ;;  %v199_v14 = vrot.slane %v198_v36, 4 }
  0x30   :  { %v193_v41 = vadd.f32 %v192_v35, %v191_v33  ;;  %v206_v42 = vrot.slane %v205_v37, 4  ;;  %v212_v22 = vsel %vm73_vm1, %v166_v29, 0.0  ;;  %v219_v6 = vsel %vm73_vm1, %v174_v34, 0.0 }
  0x31   :  { %v187_v43 = vrot.slane %v186_v40, 2  ;;  %v200_v44 = vadd.f32 %v199_v14, %v198_v36  ;;  %v213_v45 = vrot.slane %v212_v22, 4  ;;  %v220_v46 = vrot.slane %v219_v6, 4 }
  0x32   :  { %v194_v47 = vrot.slane %v193_v41, 2  ;;  %v207_v48 = vadd.f32 %v206_v42, %v205_v37  ;;  %v226_v49 = vsel %vm73_vm1, %v173_v21, 0.0  ;;  %v233_v50 = vsel %vm73_vm1, %v175_v39, 0.0 }
  0x33   :  { %v188_v51 = vadd.f32 %v187_v43, %v186_v40  ;;  %v201_v52 = vrot.slane %v200_v44, 2  ;;  %v214_v53 = vadd.f32 %v213_v45, %v212_v22  ;;  %v221_v54 = vadd.f32 %v220_v46, %v219_v6 }
  0x34   :  { %v195_v55 = vadd.f32 %v194_v47, %v193_v41  ;;  %v208_v56 = vrot.slane %v207_v48, 2  ;;  %v227_v57 = vrot.slane %v226_v49, 4  ;;  %v234_v58 = vrot.slane %v233_v50, 4 }
  0x35   :  { %v189_v59 = vrot.slane %v188_v51, 1  ;;  %v202_v60 = vadd.f32 %v201_v52, %v200_v44  ;;  %v215_v61 = vrot.slane %v214_v53, 2  ;;  %v222_v62 = vrot.slane %v221_v54, 2 }
  0x36   :  { %v196_v63 = vrot.slane %v195_v55, 1  ;;  %v209_v0 = vadd.f32 %v208_v56, %v207_v48  ;;  %v228_v1 = vadd.f32 %v227_v57, %v226_v49  ;;  %v235_v2 = vadd.f32 %v234_v58, %v233_v50 }
  0x37   :  { %v190_v3 = vadd.f32 %v189_v59, %v188_v51  ;;  %v203_v4 = vrot.slane %v202_v60, 1  ;;  %v216_v5 = vadd.f32 %v215_v61, %v214_v53  ;;  %v223_v7 = vadd.f32 %v222_v62, %v221_v54 }
  0x38   :  { %v197_v8 = vadd.f32 %v196_v63, %v195_v55  ;;  %v210_v9 = vrot.slane %v209_v0, 1  ;;  %v229_v10 = vrot.slane %v228_v1, 2  ;;  %v236_v12 = vrot.slane %v235_v2, 2 }
  0x39   :  { %v204_v13 = vadd.f32 %v203_v4, %v202_v60  ;;  %v217_v17 = vrot.slane %v216_v5, 1  ;;  %v224_v20 = vrot.slane %v223_v7, 1  ;;  %v240_v23 = vmul.f32 0.5, %v190_v3 }
  0x3a   :  { %v211_v25 = vadd.f32 %v210_v9, %v209_v0  ;;  %v230_v26 = vadd.f32 %v229_v10, %v228_v1  ;;  %v237_v28 = vadd.f32 %v236_v12, %v235_v2  ;;  %v241_v29 = vmul.f32 0.5, %v197_v8 }
  0x3b   :  { %v218_v30 = vadd.f32 %v217_v17, %v216_v5  ;;  %v225_v31 = vadd.f32 %v224_v20, %v223_v7  ;;  %v242_v21 = vmul.f32 0.5, %v204_v13  ;;  %v248_v32 = vmul.f32 %v485_v11, %v485_v11 }
  0x3c   :  { %v231_v33 = vrot.slane %v230_v26, 1  ;;  %v238_v34 = vrot.slane %v237_v28, 1  ;;  %v243_v35 = vmul.f32 0.5, %v211_v25  ;;  %v249_v36 = vmul.f32 %v487_v15, %v487_v15 }
  0x3d   :  { %v244_v37 = vmul.f32 0.5, %v218_v30  ;;  %v245_v39 = vmul.f32 0.5, %v225_v31  ;;  %v250_v40 = vmul.f32 %v491_v18, %v491_v18  ;;  %v251_v14 = vmul.f32 %v496_v24, %v496_v24 }
  0x3e   :  { %v232_v41 = vadd.f32 %v231_v33, %v230_v26  ;;  %v239_v42 = vadd.f32 %v238_v34, %v237_v28  ;;  %v252_v22 = vmul.f32 %v489_v16, %v489_v16  ;;  %v253_v11 = vmul.f32 %v493_v19, %v493_v19 }
  0x3f   :  { %v254_v6 = vmul.f32 %v502_v27, %v502_v27  ;;  %v255_v15 = vmul.f32 %v512_v38, %v512_v38  ;;  %v256_v43 = vsub.f32 %v240_v23, %v248_v32  ;;  %v257_v44 = vsub.f32 %v241_v29, %v249_v36 }
  0x40   :  { %v246_v18 = vmul.f32 0.5, %v232_v41  ;;  %v247_v45 = vmul.f32 0.5, %v239_v42  ;;  %v258_v46 = vsub.f32 %v242_v21, %v250_v40  ;;  %v259_v24 = vsub.f32 %v243_v35, %v251_v14 }
  0x41   :  { %v260_v47 = vsub.f32 %v244_v37, %v252_v22  ;;  %v261_v48 = vsub.f32 %v245_v39, %v253_v11  ;;  %v264_v49 = vmax.f32 %v256_v43, 0.0  ;;  %v265_v50 = vmax.f32 %v257_v44, 0.0 }
  0x42   :  { %v262_v16 = vsub.f32 %v246_v18, %v254_v6  ;;  %v263_v51 = vsub.f32 %v247_v45, %v255_v15  ;;  %v266_v52 = vmax.f32 %v258_v46, 0.0  ;;  %v267_v19 = vmax.f32 %v259_v24, 0.0 }
  0x43   :  { %v268_v53 = vmax.f32 %v260_v47, 0.0  ;;  %v269_v54 = vmax.f32 %v261_v48, 0.0  ;;  %v272_v27 = vadd.f32 1e-08, %v264_v49  ;;  %v273_v55 = vadd.f32 1e-08, %v265_v50 }
  0x44   :  { %v270_v56 = vmax.f32 %v262_v16, 0.0  ;;  %v274_v38 = vadd.f32 1e-08, %v266_v52  ;;  %v271_v57 = vmax.f32 %v263_v51, 0.0  ;;  %v275_v58 = vadd.f32 1e-08, %v267_v19 }
  0x45   :  { %370 = vrsqrt.f32 %v272_v27  ;;  %v276_v59 = vadd.f32 1e-08, %v268_v53  ;;  %v534_v60 = vadd.f32 1e-08, %v269_v54  ;;  %vm282_vm2 = vcmp.eq.f32.partialorder %v272_v27, inf }
  0x46   :  { %372 = vrsqrt.f32 %v273_v55  ;;  %v536_v61 = vadd.f32 1e-08, %v270_v56  ;;  %v538_v62 = vadd.f32 1e-08, %v271_v57  ;;  %vm284_vm3 = vcmp.eq.f32.partialorder %v272_v27, 0.0 }
  0x47   :  { %374 = vrsqrt.f32 %v274_v38  ;;  %v285_v0 = vand.u32 2147483648, %v272_v27  ;;  %vm289_vm4 = vcmp.eq.f32.partialorder %v273_v55, inf  ;;  %vm291_vm5 = vcmp.eq.f32.partialorder %v273_v55, 0.0  ;;  %v336_v50 = vld [vmem:[#allocation5] sm:$0x1] }
  0x48   :  { %376 = vrsqrt.f32 %v275_v58  ;;  %v292_v2 = vand.u32 2147483648, %v273_v55  ;;  %vm296_vm6 = vcmp.eq.f32.partialorder %v274_v38, inf  ;;  %vm298_vm7 = vcmp.eq.f32.partialorder %v274_v38, 0.0 }
  0x49   :  { %378 = vrsqrt.f32 %v276_v59  ;;  %v299_v4 = vand.u32 2147483648, %v274_v38  ;;  %vm303_vm8 = vcmp.eq.f32.partialorder %v275_v58, inf  ;;  %vm305_vm9 = vcmp.eq.f32.partialorder %v275_v58, 0.0 }
  0x4a   :  { %380 = vrsqrt.f32 %v534_v60  ;;  %v306_v9 = vand.u32 2147483648, %v275_v58  ;;  %vm310_vm10 = vcmp.eq.f32.partialorder %v276_v59, inf  ;;  %vm312_vm11 = vcmp.eq.f32.partialorder %v276_v59, 0.0 }
  0x4b   :  { %382 = vrsqrt.f32 %v536_v61  ;;  %v313_v25 = vand.u32 2147483648, %v276_v59  ;;  %vm317_vm12 = vcmp.eq.f32.partialorder %v534_v60, inf  ;;  %v320_v31 = vand.u32 2147483648, %v534_v60 }
  0x4c   :  { %384 = vrsqrt.f32 %v538_v62  ;;  %vm324_vm13 = vcmp.eq.f32.partialorder %v536_v61, inf  ;;  %vm319_vm14 = vcmp.eq.f32.partialorder %v534_v60, 0.0  ;;  %v327_v11 = vand.u32 2147483648, %v536_v61 }
  0x4d   :  { %vm331_vm15 = vcmp.eq.f32.partialorder %v538_v62, inf  ;;  %vm326_vm1 = vcmp.eq.f32.partialorder %v536_v61, 0.0  ;;  %v334_v44 = vand.u32 2147483648, %v538_v62 }
  0x4f   :  { %v371_v63 = vpop.eup %370 }
  0x50   :  { %v281_v1 = vmul.f32 %v371_v63, %v272_v27  ;;  %v373_v3 = vpop.eup %372 }
  0x51   :  { %v375_v5 = vpop.eup %374  ;;  %v288_v8 = vmul.f32 %v373_v3, %v273_v55 }
  0x52   :  { %v283_v7 = vsel %vm282_vm2, %v272_v27, %v281_v1  ;;  %v377_v10 = vpop.eup %376  ;;  %v295_v13 = vmul.f32 %v375_v5, %v274_v38  ;;  %vm333_vm2 = vcmp.eq.f32.partialorder %v538_v62, 0.0 }
  0x53   :  { %v286_v12 = vsel %vm284_vm3, %v285_v0, %v283_v7  ;;  %v379_v17 = vpop.eup %378  ;;  %v290_v20 = vsel %vm289_vm4, %v273_v55, %v288_v8  ;;  %v302_v23 = vmul.f32 %v377_v10, %v275_v58 }
  0x54   :  { %v381_v26 = vpop.eup %380  ;;  %v293_v28 = vsel %vm291_vm5, %v292_v2, %v290_v20  ;;  %v297_v29 = vsel %vm296_vm6, %v274_v38, %v295_v13  ;;  %v309_v30 = vmul.f32 %v379_v17, %v276_v59 }
  0x55   :  { %v383_v21 = vpop.eup %382  ;;  %v300_v32 = vsel %vm298_vm7, %v299_v4, %v297_v29  ;;  %v304_v33 = vsel %vm303_vm8, %v275_v58, %v302_v23  ;;  %v316_v34 = vmul.f32 %v381_v26, %v534_v60  ;;  %v337_v35 = vadd.f32 %v293_v28, %v286_v12 }
  0x56   :  { %v385_v36 = vpop.eup %384  ;;  %v307_v37 = vsel %vm305_vm9, %v306_v9, %v304_v33  ;;  %v311_v39 = vsel %vm310_vm10, %v276_v59, %v309_v30  ;;  %v323_v40 = vmul.f32 %v383_v21, %v536_v61 }
  0x57   :  { %v318_v14 = vsel %vm317_vm12, %v534_v60, %v316_v34  ;;  %v330_v41 = vmul.f32 %v385_v36, %v538_v62  ;;  %v338_v42 = vadd.f32 %v337_v35, %v300_v32  ;;  %v314_v22 = vsel %vm312_vm11, %v313_v25, %v311_v39 }
  0x58   :  { %v325_v6 = vsel %vm324_vm13, %v536_v61, %v323_v40  ;;  %v321_v43 = vsel %vm319_vm14, %v320_v31, %v318_v14 }
  0x59   :  { %v339_v15 = vadd.f32 %v338_v42, %v307_v37  ;;  %v332_v18 = vsel %vm331_vm15, %v538_v62, %v330_v41  ;;  %v328_v46 = vsel %vm326_vm1, %v327_v11, %v325_v6 }
  0x5a   :  { %v335_v47 = vsel %vm333_vm2, %v334_v44, %v332_v18 }
  0x5b   :  { %v340_v45 = vadd.f32 %v339_v15, %v314_v22 }
  0x5d   :  { %v341_v24 = vadd.f32 %v340_v45, %v321_v43 }
  0x5f   :  { %v342_v48 = vadd.f32 %v341_v24, %v328_v46 }
  0x61   :  { %v343_v49 = vadd.f32 %v342_v48, %v335_v47 }
  0x63   :  { %344 = vadd.xlane.f32.xlu0 %v343_v49 }
  0xf0   :  { %v345_v16 = vpop.xlane.xlu0 %344 }
  0xf1   :  { %v346_v51 = vadd.f32 %v345_v16, %v336_v50 }
  0xf3   :  { %348 = vst.msk [vmem:[#allocation5] sm:$0x1] %vm25_vm0, %v346_v51 }
  0xf4   :  { %419 = shalt.err (!%p416_p12)
}
  0xf5   :  { %s420_s23 = scalar_lea.hbm %s583_s1, 16 }
  0xf6   :  { %p421_p13 = scmp.ne.s32.totalorder %s583_s1, %s420_s23  ;;  %p424_p0 = scmp.lt.u32.totalorder %s420_s23, %s583_s1 }
  0xf8   :  { %p426_p1 = pnand %p424_p0, %p421_p13 }
  0xfa   :  { %429 = shalt.err (!%p426_p1)
}
  0xfb   :  { %358 = dma.vmem_to_hbm [thread:$0]  %s356_s18, 16, %s583_s1, [#allocation4]  }
  0xfc   :  { %432 = dma.done.wait [#allocation4], 16  }
  0xfd   :  { %433 = vsyncadd [#allocation4], 4294967280 }
  0xfe   :  { %362 = vsyncpa [#allocation3], 1 }
  0xff   :  { %363 = vsyncpa [#allocation4], 1 }

</bundles_post_ra>
